<compile_context>
chip_gen: v7x
topology: tpu7x:2x2x1
jax: 0.10.0
libtpu: 0.0.40
codegen_flags: <defaults>
</compile_context>

<pallas_src>
import functools

import jax
import jax.numpy as jnp
import numpy as np
from jax.experimental import pallas as pl
from jax.experimental.pallas import tpu as pltpu

EPS = 1e-6  # LayerNorm eps in the reference module


# ------------------------------- activations --------------------------------

def _apply_act(y, act):
    if act == "relu":
        return jnp.maximum(y, 0.0)
    if act == "leaky_relu":
        return jnp.where(y > 0, y, 0.2 * y)
    if act == "tanh":
        return jnp.tanh(y)
    if act == "sigmoid":
        return jax.nn.sigmoid(y)
    if act == "elu":
        return jnp.where(y > 0, y, jnp.expm1(jnp.minimum(y, 0.0)))
    return y  # 'linear'


# --------------------------- fused forward kernel ----------------------------

def _fused_cnn_kernel(*refs, layers, use_ln_inp, W):
    x_ref, g0_ref, b0_ref = refs[0], refs[1], refs[2]
    o_ref = refs[-1]
    layer_refs = refs[3:-1]

    h = x_ref[0].astype(jnp.float32)                        # (C_in, W)

    if use_ln_inp:
        mean = jnp.mean(h, axis=-1, keepdims=True)
        var = jnp.sum((h - mean) ** 2, axis=-1, keepdims=True) / (W - 1)
        inv = pl.reciprocal(jnp.sqrt(var) + EPS, approx=True)   # unbiased std, torch-style
        h = g0_ref[...] * (h - mean) * inv + b0_ref[...]
    # TODO(synk): cnn_use_batchnorm_inp / per-layer BatchNorm2d branch not
    # implemented (disabled by the chosen config; the reference BatchNorm2d
    # constructor args are malformed).

    for li, cfg in enumerate(layers):
        w_ref, g_ref, bt_ref = layer_refs[3 * li: 3 * li + 3]
        K, pool = cfg["K"], cfg["pool"]
        L_conv, L_out = cfg["L_conv"], cfg["L_out"]

        # Conv2d(kernel=(1,K)) == 1-D valid cross-correlation as ONE im2col
        # matmul.  Row k*C_in + c of im2col is h[c, k:k+L_conv]; the final
        # ones-row folds the bias (last column of w_aug) into the same matmul.
        cols = [h[:, k:k + L_conv] for k in range(K)]
        cols.append(jnp.ones((1, L_conv), jnp.float32))
        im2col = jnp.concatenate(cols, axis=0)              # (K*C_in + 1, L_conv)
        acc = jnp.dot(w_ref[...].astype(jnp.float32), im2col,
                      preferred_element_type=jnp.float32)   # (C_out, L_conv)

        if cfg["use_abs"]:                                  # torch.abs before pooling (layer 0, laynorm path)
            acc = jnp.abs(acc)

        # max_pool2d(kernel=(1, pool)): in-register.  For each in-window offset
        # p, downselect columns l*pool+p with an exact 0/1 matmul, then take the
        # element-wise max — no VMEM scratch, no lane-strided loads.
        row = jax.lax.broadcasted_iota(jnp.int32, (L_conv, L_out), 0)
        col = jax.lax.broadcasted_iota(jnp.int32, (L_conv, L_out), 1)
        pooled = None
        for p in range(pool):
            sel = (row == col * pool + p).astype(jnp.float32)
            v = jnp.dot(acc, sel, preferred_element_type=jnp.float32)
            pooled = v if pooled is None else jnp.maximum(pooled, v)

        if cfg["use_ln"]:
            mean = jnp.mean(pooled, axis=-1, keepdims=True)
            var = jnp.sum((pooled - mean) ** 2, axis=-1, keepdims=True) / (L_out - 1)
            inv = pl.reciprocal(jnp.sqrt(var) + EPS, approx=True)
            pooled = g_ref[...] * (pooled - mean) * inv + bt_ref[...]

        h = _apply_act(pooled, cfg["act"])
        # TODO(synk): Dropout is identity here (p=0.0 / inference mode).

    o_ref[0] = h.astype(o_ref.dtype)


# ------------------------------ full forward ---------------------------------

def cnn_forward(x, params, options):
    """x: (B, num_data_channels=6, 1, input_dim), NCHW like the PyTorch module."""
    B, C, H, W = x.shape
    assert H == 1
    x3 = x.reshape(B, C, W)

    n_layers = len(options["cnn_N_filt"])
    inputs = [
        x3,
        params["ln0_gamma"].reshape(1, W).astype(jnp.float32),
        params["ln0_beta"].reshape(1, W).astype(jnp.float32),
    ]
    in_specs = [
        pl.BlockSpec((1, C, W), lambda bi: (bi, 0, 0)),
        pl.BlockSpec((1, W), lambda bi: (0, 0)),
        pl.BlockSpec((1, W), lambda bi: (0, 0)),
    ]

    layers = []
    cur_len, cur_ch = W, C
    for i in range(n_layers):
        w = params["conv_w"][i].astype(jnp.float32)
        b = params["conv_b"][i].astype(jnp.float32)
        C_out, C_in, K = w.shape
        assert C_in == cur_ch
        pool = int(options["cnn_max_pool_len"][i])
        L_conv = cur_len - K + 1
        L_out = L_conv // pool
        use_ln = bool(options["cnn_use_laynorm"][i])

        # (C_out, K*C_in + 1): column k*C_in + c = w[o, c, k]; last column = bias.
        w_aug = jnp.concatenate(
            [jnp.transpose(w, (0, 2, 1)).reshape(C_out, K * C_in), b[:, None]],
            axis=1)
        if use_ln:
            g = params["ln_gamma"][i].astype(jnp.float32)
            bt = params["ln_beta"][i].astype(jnp.float32)
        else:
            g = jnp.ones((C_out, L_out), jnp.float32)
            bt = jnp.zeros((C_out, L_out), jnp.float32)

        inputs += [w_aug, g, bt]
        in_specs += [
            pl.BlockSpec(tuple(w_aug.shape), lambda bi: (0, 0)),
            pl.BlockSpec((C_out, L_out), lambda bi: (0, 0)),
            pl.BlockSpec((C_out, L_out), lambda bi: (0, 0)),
        ]
        layers.append(dict(K=K, C_in=C_in, C_out=C_out, pool=pool, L_conv=L_conv,
                           L_out=L_out, use_abs=(i == 0 and use_ln),
                           use_ln=use_ln, act=options["cnn_act"][i]))
        cur_len, cur_ch = L_out, C_out

    kernel = functools.partial(
        _fused_cnn_kernel,
        layers=tuple(layers),
        use_ln_inp=bool(options["cnn_use_laynorm_inp"]),
        W=W)

    out = pl.pallas_call(
        kernel,
        out_shape=jax.ShapeDtypeStruct((B, cur_ch, cur_len), x.dtype),
        grid=(B,),
        in_specs=in_specs,
        out_specs=pl.BlockSpec((1, cur_ch, cur_len), lambda bi: (bi, 0, 0)),
        compiler_params=pltpu.CompilerParams(dimension_semantics=("parallel",)),
    )(*inputs)

    return out[:, :, None, :]  # back to (B, N_filt, 1, L_out)


# ------------------------------ pure-JAX reference ---------------------------

def reference_forward(x, params, options):
    B, C, H, W = x.shape
    x = x.reshape(B, C, W).astype(jnp.float32)
    if options["cnn_use_laynorm_inp"]:
        mean = x.mean(-1, keepdims=True)
        std = jnp.sqrt(((x - mean) ** 2).sum(-1, keepdims=True) / (x.shape[-1] - 1))
        x = params["ln0_gamma"] * (x - mean) / (std + EPS) + params["ln0_beta"]
    for i in range(len(options["cnn_N_filt"])):
        w = params["conv_w"][i]
        b = params["conv_b"][i]
        C_out, C_in, K = w.shape
        L_conv = x.shape[-1] - K + 1
        y = jnp.zeros((x.shape[0], C_out, L_conv), jnp.float32)
        for k in range(K):
            y = y + jnp.einsum("oc,bcl->bol", w[:, :, k], x[:, :, k:k + L_conv])
        y = y + b[None, :, None]
        use_ln = bool(options["cnn_use_laynorm"][i])
        if i == 0 and use_ln:
            y = jnp.abs(y)
        pool = int(options["cnn_max_pool_len"][i])
        L_out = L_conv // pool
        y = y[:, :, :L_out * pool].reshape(x.shape[0], C_out, L_out, pool).max(-1)
        if use_ln:
            mean = y.mean(-1, keepdims=True)
            std = jnp.sqrt(((y - mean) ** 2).sum(-1, keepdims=True) / (L_out - 1))
            y = params["ln_gamma"][i][None] * (y - mean) / (std + EPS) + params["ln_beta"][i][None]
        y = _apply_act(y, options["cnn_act"][i])
        x = y
    return x[:, :, None, :]


# ----------------------------------- main ------------------------------------

if __name__ == "__main__":
    options = {
        "cnn_N_filt": [8, 8],
        "cnn_len_filt": [5, 3],
        "cnn_max_pool_len": [2, 2],
        "cnn_act": ["relu", "leaky_relu"],
        "cnn_drop": [0.0, 0.0],
        "cnn_use_laynorm": [True, True],
        "cnn_use_batchnorm": [False, False],
        "cnn_use_laynorm_inp": True,
        "cnn_use_batchnorm_inp": False,
        "input_dim": 64,
    }
    batch = 2
    num_data_channels = 6  # fixed in the module
    input_dim = options["input_dim"]

    key = jax.random.PRNGKey(0)
    k_x, k_w0, k_b0, k_w1, k_b1, k_g = jax.random.split(key, 6)
    kg0, kb0, kg1, kb1, kgi, kbi = jax.random.split(k_g, 6)

    x = jax.random.normal(k_x, (batch, num_data_channels, 1, input_dim), jnp.float32)

    # deterministic parameter init (shapes per module __init__)
    L0 = (input_dim - options["cnn_len_filt"][0] + 1) // options["cnn_max_pool_len"][0]  # 30
    L1 = (L0 - options["cnn_len_filt"][1] + 1) // options["cnn_max_pool_len"][1]         # 14
    params = {
        "ln0_gamma": 1.0 + 0.1 * jax.random.normal(kgi, (input_dim,), jnp.float32),
        "ln0_beta": 0.1 * jax.random.normal(kbi, (input_dim,), jnp.float32),
        "conv_w": [
            0.1 * jax.random.normal(k_w0, (8, num_data_channels, options["cnn_len_filt"][0]), jnp.float32),
            0.1 * jax.random.normal(k_w1, (8, 8, options["cnn_len_filt"][1]), jnp.float32),
        ],
        "conv_b": [
            0.1 * jax.random.normal(k_b0, (8,), jnp.float32),
            0.1 * jax.random.normal(k_b1, (8,), jnp.float32),
        ],
        # LayerNorm([N_filt, 1, L_out]) params (H=1 squeezed)
        "ln_gamma": [1.0 + 0.1 * jax.random.normal(kg0, (8, L0), jnp.float32),
                     1.0 + 0.1 * jax.random.normal(kg1, (8, L1), jnp.float32)],
        "ln_beta": [0.1 * jax.random.normal(kb0, (8, L0), jnp.float32),
                    0.1 * jax.random.normal(kb1, (8, L1), jnp.float32)],
    }

    out = cnn_forward(x, params, options)
    out = jax.block_until_ready(out)

    ref = reference_forward(x, params, options)
    assert out.shape == (batch, 8, 1, L1), out.shape
    np.testing.assert_allclose(np.asarray(out), np.asarray(ref), rtol=5e-2, atol=5e-2)

    print("KERNEL_OK")
</pallas_src>

<mosaic_0001>
module attributes {stable_mosaic.version = 11 : i64} {
  func.func @_fused_cnn_kernel(%arg0: i32, %arg1: memref<1x6x64xf32, #tpu.memory_space<vmem>>, %arg2: memref<1x64xf32, #tpu.memory_space<vmem>>, %arg3: memref<1x64xf32, #tpu.memory_space<vmem>>, %arg4: memref<8x31xf32, #tpu.memory_space<vmem>>, %arg5: memref<8x30xf32, #tpu.memory_space<vmem>>, %arg6: memref<8x30xf32, #tpu.memory_space<vmem>>, %arg7: memref<8x25xf32, #tpu.memory_space<vmem>>, %arg8: memref<8x14xf32, #tpu.memory_space<vmem>>, %arg9: memref<8x14xf32, #tpu.memory_space<vmem>>, %arg10: memref<1x8x14xf32, #tpu.memory_space<vmem>>) attributes {dimension_semantics = [#tpu.dimension_semantics<parallel>], iteration_bounds = array<i64: 2>, scalar_prefetch = 0 : i64, scratch_operands = 0 : i64, tpu.core_type = #tpu.core_type<tc>, window_params = [{transform_indices = @transform_0, window_bounds = array<i64: 1, 6, 64>}, {pipeline_mode = #tpu.pipeline_mode<synchronous>, transform_indices = @transform_1, window_bounds = array<i64: 1, 64>}, {pipeline_mode = #tpu.pipeline_mode<synchronous>, transform_indices = @transform_2, window_bounds = array<i64: 1, 64>}, {pipeline_mode = #tpu.pipeline_mode<synchronous>, transform_indices = @transform_3, window_bounds = array<i64: 8, 31>}, {pipeline_mode = #tpu.pipeline_mode<synchronous>, transform_indices = @transform_4, window_bounds = array<i64: 8, 30>}, {pipeline_mode = #tpu.pipeline_mode<synchronous>, transform_indices = @transform_5, window_bounds = array<i64: 8, 30>}, {pipeline_mode = #tpu.pipeline_mode<synchronous>, transform_indices = @transform_6, window_bounds = array<i64: 8, 25>}, {pipeline_mode = #tpu.pipeline_mode<synchronous>, transform_indices = @transform_7, window_bounds = array<i64: 8, 14>}, {pipeline_mode = #tpu.pipeline_mode<synchronous>, transform_indices = @transform_8, window_bounds = array<i64: 8, 14>}, {transform_indices = @transform_9, window_bounds = array<i64: 1, 8, 14>}]} {
    %c0 = arith.constant 0 : index
    %c0_0 = arith.constant 0 : index
    %c0_1 = arith.constant 0 : index
    %0 = vector.load %arg1[%c0, %c0_0, %c0_1] : memref<1x6x64xf32, #tpu.memory_space<vmem>>, vector<1x6x64xf32>
    %1 = vector.shape_cast %0 : vector<1x6x64xf32> to vector<6x64xf32>
    %cst = arith.constant dense<0.000000e+00> : vector<6xf32>
    %2 = vector.multi_reduction <add>, %1, %cst [1] : vector<6x64xf32> to vector<6xf32>
    %3 = vector.shape_cast %2 : vector<6xf32> to vector<6x1xf32>
    %cst_2 = arith.constant 6.400000e+01 : f32
    %4 = vector.broadcast %cst_2 : f32 to vector<6x1xf32>
    %5 = arith.divf %3, %4 : vector<6x1xf32>
    %6 = vector.broadcast %5 : vector<6x1xf32> to vector<6x64xf32>
    %7 = arith.subf %1, %6 : vector<6x64xf32>
    %8 = arith.mulf %7, %7 : vector<6x64xf32>
    %cst_3 = arith.constant dense<0.000000e+00> : vector<6xf32>
    %9 = vector.multi_reduction <add>, %8, %cst_3 [1] : vector<6x64xf32> to vector<6xf32>
    %10 = vector.shape_cast %9 : vector<6xf32> to vector<6x1xf32>
    %cst_4 = arith.constant 6.300000e+01 : f32
    %11 = vector.broadcast %cst_4 : f32 to vector<6x1xf32>
    %12 = arith.divf %10, %11 : vector<6x1xf32>
    %13 = math.sqrt %12 : vector<6x1xf32>
    %cst_5 = arith.constant 9.99999997E-7 : f32
    %14 = vector.broadcast %cst_5 : f32 to vector<6x1xf32>
    %15 = arith.addf %13, %14 : vector<6x1xf32>
    %16 = tpu.reciprocal %15 {approx = true} : vector<6x1xf32> -> vector<6x1xf32>
    %c0_6 = arith.constant 0 : index
    %c0_7 = arith.constant 0 : index
    %17 = vector.load %arg2[%c0_6, %c0_7] : memref<1x64xf32, #tpu.memory_space<vmem>>, vector<1x64xf32>
    %18 = vector.broadcast %5 : vector<6x1xf32> to vector<6x64xf32>
    %19 = arith.subf %1, %18 : vector<6x64xf32>
    %20 = vector.broadcast %17 : vector<1x64xf32> to vector<6x64xf32>
    %21 = arith.mulf %20, %19 : vector<6x64xf32>
    %22 = vector.broadcast %16 : vector<6x1xf32> to vector<6x64xf32>
    %23 = arith.mulf %21, %22 : vector<6x64xf32>
    %c0_8 = arith.constant 0 : index
    %c0_9 = arith.constant 0 : index
    %24 = vector.load %arg3[%c0_8, %c0_9] : memref<1x64xf32, #tpu.memory_space<vmem>>, vector<1x64xf32>
    %25 = vector.broadcast %24 : vector<1x64xf32> to vector<6x64xf32>
    %26 = arith.addf %23, %25 : vector<6x64xf32>
    %27 = vector.extract_strided_slice %26 {offsets = [0, 0], sizes = [6, 60], strides = [1, 1]} : vector<6x64xf32> to vector<6x60xf32>
    %28 = vector.extract_strided_slice %26 {offsets = [0, 1], sizes = [6, 60], strides = [1, 1]} : vector<6x64xf32> to vector<6x60xf32>
    %29 = vector.extract_strided_slice %26 {offsets = [0, 2], sizes = [6, 60], strides = [1, 1]} : vector<6x64xf32> to vector<6x60xf32>
    %30 = vector.extract_strided_slice %26 {offsets = [0, 3], sizes = [6, 60], strides = [1, 1]} : vector<6x64xf32> to vector<6x60xf32>
    %31 = vector.extract_strided_slice %26 {offsets = [0, 4], sizes = [6, 60], strides = [1, 1]} : vector<6x64xf32> to vector<6x60xf32>
    %cst_10 = arith.constant 1.000000e+00 : f32
    %32 = vector.broadcast %cst_10 : f32 to vector<1x60xf32>
    %33 = tpu.concatenate %27, %28, %29, %30, %31, %32 in 0 : vector<6x60xf32>, vector<6x60xf32>, vector<6x60xf32>, vector<6x60xf32>, vector<6x60xf32>, vector<1x60xf32> -> vector<31x60xf32>
    %c0_11 = arith.constant 0 : index
    %c0_12 = arith.constant 0 : index
    %34 = vector.load %arg4[%c0_11, %c0_12] : memref<8x31xf32, #tpu.memory_space<vmem>>, vector<8x31xf32>
    %cst_13 = arith.constant dense<0.000000e+00> : vector<8x60xf32>
    %35 = tpu.matmul %34, %33, %cst_13 {dimension_numbers = #tpu.dot_dimension_numbers<[1], [0], [0], [1], [0, 0, 1, 1], [], []>} : vector<8x31xf32>, vector<31x60xf32>, vector<8x60xf32> -> vector<8x60xf32>
    %36 = math.absf %35 : vector<8x60xf32>
    %37 = tpu.iota {dimensions = array<i32: 0>} : vector<60x30xi32>
    %38 = tpu.iota {dimensions = array<i32: 1>} : vector<60x30xi32>
    %c2_i32 = arith.constant 2 : i32
    %39 = vector.broadcast %c2_i32 : i32 to vector<60x30xi32>
    %40 = arith.muli %38, %39 : vector<60x30xi32>
    %c0_i32 = arith.constant 0 : i32
    %41 = vector.broadcast %c0_i32 : i32 to vector<60x30xi32>
    %42 = arith.addi %40, %41 : vector<60x30xi32>
    %43 = arith.cmpi eq, %37, %42 : vector<60x30xi32>
    %44 = arith.extui %43 : vector<60x30xi1> to vector<60x30xi32>
    %45 = arith.sitofp %44 : vector<60x30xi32> to vector<60x30xf32>
    %cst_14 = arith.constant dense<0.000000e+00> : vector<8x30xf32>
    %46 = tpu.matmul %36, %45, %cst_14 {dimension_numbers = #tpu.dot_dimension_numbers<[1], [0], [0], [1], [0, 0, 1, 1], [], []>} : vector<8x60xf32>, vector<60x30xf32>, vector<8x30xf32> -> vector<8x30xf32>
    %c2_i32_15 = arith.constant 2 : i32
    %47 = vector.broadcast %c2_i32_15 : i32 to vector<60x30xi32>
    %48 = arith.muli %38, %47 : vector<60x30xi32>
    %c1_i32 = arith.constant 1 : i32
    %49 = vector.broadcast %c1_i32 : i32 to vector<60x30xi32>
    %50 = arith.addi %48, %49 : vector<60x30xi32>
    %51 = arith.cmpi eq, %37, %50 : vector<60x30xi32>
    %52 = arith.extui %51 : vector<60x30xi1> to vector<60x30xi32>
    %53 = arith.sitofp %52 : vector<60x30xi32> to vector<60x30xf32>
    %cst_16 = arith.constant dense<0.000000e+00> : vector<8x30xf32>
    %54 = tpu.matmul %36, %53, %cst_16 {dimension_numbers = #tpu.dot_dimension_numbers<[1], [0], [0], [1], [0, 0, 1, 1], [], []>} : vector<8x60xf32>, vector<60x30xf32>, vector<8x30xf32> -> vector<8x30xf32>
    %55 = arith.maximumf %46, %54 : vector<8x30xf32>
    %cst_17 = arith.constant dense<0.000000e+00> : vector<8xf32>
    %56 = vector.multi_reduction <add>, %55, %cst_17 [1] : vector<8x30xf32> to vector<8xf32>
    %57 = vector.shape_cast %56 : vector<8xf32> to vector<8x1xf32>
    %cst_18 = arith.constant 3.000000e+01 : f32
    %58 = vector.broadcast %cst_18 : f32 to vector<8x1xf32>
    %59 = arith.divf %57, %58 : vector<8x1xf32>
    %60 = vector.broadcast %59 : vector<8x1xf32> to vector<8x30xf32>
    %61 = arith.subf %55, %60 : vector<8x30xf32>
    %62 = arith.mulf %61, %61 : vector<8x30xf32>
    %cst_19 = arith.constant dense<0.000000e+00> : vector<8xf32>
    %63 = vector.multi_reduction <add>, %62, %cst_19 [1] : vector<8x30xf32> to vector<8xf32>
    %64 = vector.shape_cast %63 : vector<8xf32> to vector<8x1xf32>
    %cst_20 = arith.constant 2.900000e+01 : f32
    %65 = vector.broadcast %cst_20 : f32 to vector<8x1xf32>
    %66 = arith.divf %64, %65 : vector<8x1xf32>
    %67 = math.sqrt %66 : vector<8x1xf32>
    %cst_21 = arith.constant 9.99999997E-7 : f32
    %68 = vector.broadcast %cst_21 : f32 to vector<8x1xf32>
    %69 = arith.addf %67, %68 : vector<8x1xf32>
    %70 = tpu.reciprocal %69 {approx = true} : vector<8x1xf32> -> vector<8x1xf32>
    %c0_22 = arith.constant 0 : index
    %c0_23 = arith.constant 0 : index
    %71 = vector.load %arg5[%c0_22, %c0_23] : memref<8x30xf32, #tpu.memory_space<vmem>>, vector<8x30xf32>
    %72 = vector.broadcast %59 : vector<8x1xf32> to vector<8x30xf32>
    %73 = arith.subf %55, %72 : vector<8x30xf32>
    %74 = arith.mulf %71, %73 : vector<8x30xf32>
    %75 = vector.broadcast %70 : vector<8x1xf32> to vector<8x30xf32>
    %76 = arith.mulf %74, %75 : vector<8x30xf32>
    %c0_24 = arith.constant 0 : index
    %c0_25 = arith.constant 0 : index
    %77 = vector.load %arg6[%c0_24, %c0_25] : memref<8x30xf32, #tpu.memory_space<vmem>>, vector<8x30xf32>
    %78 = arith.addf %76, %77 : vector<8x30xf32>
    %cst_26 = arith.constant 0.000000e+00 : f32
    %79 = vector.broadcast %cst_26 : f32 to vector<8x30xf32>
    %80 = arith.maximumf %78, %79 : vector<8x30xf32>
    %81 = vector.extract_strided_slice %80 {offsets = [0, 0], sizes = [8, 28], strides = [1, 1]} : vector<8x30xf32> to vector<8x28xf32>
    %82 = vector.extract_strided_slice %80 {offsets = [0, 1], sizes = [8, 28], strides = [1, 1]} : vector<8x30xf32> to vector<8x28xf32>
    %83 = vector.extract_strided_slice %80 {offsets = [0, 2], sizes = [8, 28], strides = [1, 1]} : vector<8x30xf32> to vector<8x28xf32>
    %cst_27 = arith.constant 1.000000e+00 : f32
    %84 = vector.broadcast %cst_27 : f32 to vector<1x28xf32>
    %85 = tpu.concatenate %81, %82, %83, %84 in 0 : vector<8x28xf32>, vector<8x28xf32>, vector<8x28xf32>, vector<1x28xf32> -> vector<25x28xf32>
    %c0_28 = arith.constant 0 : index
    %c0_29 = arith.constant 0 : index
    %86 = vector.load %arg7[%c0_28, %c0_29] : memref<8x25xf32, #tpu.memory_space<vmem>>, vector<8x25xf32>
    %cst_30 = arith.constant dense<0.000000e+00> : vector<8x28xf32>
    %87 = tpu.matmul %86, %85, %cst_30 {dimension_numbers = #tpu.dot_dimension_numbers<[1], [0], [0], [1], [0, 0, 1, 1], [], []>} : vector<8x25xf32>, vector<25x28xf32>, vector<8x28xf32> -> vector<8x28xf32>
    %88 = tpu.iota {dimensions = array<i32: 0>} : vector<28x14xi32>
    %89 = tpu.iota {dimensions = array<i32: 1>} : vector<28x14xi32>
    %c2_i32_31 = arith.constant 2 : i32
    %90 = vector.broadcast %c2_i32_31 : i32 to vector<28x14xi32>
    %91 = arith.muli %89, %90 : vector<28x14xi32>
    %c0_i32_32 = arith.constant 0 : i32
    %92 = vector.broadcast %c0_i32_32 : i32 to vector<28x14xi32>
    %93 = arith.addi %91, %92 : vector<28x14xi32>
    %94 = arith.cmpi eq, %88, %93 : vector<28x14xi32>
    %95 = arith.extui %94 : vector<28x14xi1> to vector<28x14xi32>
    %96 = arith.sitofp %95 : vector<28x14xi32> to vector<28x14xf32>
    %cst_33 = arith.constant dense<0.000000e+00> : vector<8x14xf32>
    %97 = tpu.matmul %87, %96, %cst_33 {dimension_numbers = #tpu.dot_dimension_numbers<[1], [0], [0], [1], [0, 0, 1, 1], [], []>} : vector<8x28xf32>, vector<28x14xf32>, vector<8x14xf32> -> vector<8x14xf32>
    %c2_i32_34 = arith.constant 2 : i32
    %98 = vector.broadcast %c2_i32_34 : i32 to vector<28x14xi32>
    %99 = arith.muli %89, %98 : vector<28x14xi32>
    %c1_i32_35 = arith.constant 1 : i32
    %100 = vector.broadcast %c1_i32_35 : i32 to vector<28x14xi32>
    %101 = arith.addi %99, %100 : vector<28x14xi32>
    %102 = arith.cmpi eq, %88, %101 : vector<28x14xi32>
    %103 = arith.extui %102 : vector<28x14xi1> to vector<28x14xi32>
    %104 = arith.sitofp %103 : vector<28x14xi32> to vector<28x14xf32>
    %cst_36 = arith.constant dense<0.000000e+00> : vector<8x14xf32>
    %105 = tpu.matmul %87, %104, %cst_36 {dimension_numbers = #tpu.dot_dimension_numbers<[1], [0], [0], [1], [0, 0, 1, 1], [], []>} : vector<8x28xf32>, vector<28x14xf32>, vector<8x14xf32> -> vector<8x14xf32>
    %106 = arith.maximumf %97, %105 : vector<8x14xf32>
    %cst_37 = arith.constant dense<0.000000e+00> : vector<8xf32>
    %107 = vector.multi_reduction <add>, %106, %cst_37 [1] : vector<8x14xf32> to vector<8xf32>
    %108 = vector.shape_cast %107 : vector<8xf32> to vector<8x1xf32>
    %cst_38 = arith.constant 1.400000e+01 : f32
    %109 = vector.broadcast %cst_38 : f32 to vector<8x1xf32>
    %110 = arith.divf %108, %109 : vector<8x1xf32>
    %111 = vector.broadcast %110 : vector<8x1xf32> to vector<8x14xf32>
    %112 = arith.subf %106, %111 : vector<8x14xf32>
    %113 = arith.mulf %112, %112 : vector<8x14xf32>
    %cst_39 = arith.constant dense<0.000000e+00> : vector<8xf32>
    %114 = vector.multi_reduction <add>, %113, %cst_39 [1] : vector<8x14xf32> to vector<8xf32>
    %115 = vector.shape_cast %114 : vector<8xf32> to vector<8x1xf32>
    %cst_40 = arith.constant 1.300000e+01 : f32
    %116 = vector.broadcast %cst_40 : f32 to vector<8x1xf32>
    %117 = arith.divf %115, %116 : vector<8x1xf32>
    %118 = math.sqrt %117 : vector<8x1xf32>
    %cst_41 = arith.constant 9.99999997E-7 : f32
    %119 = vector.broadcast %cst_41 : f32 to vector<8x1xf32>
    %120 = arith.addf %118, %119 : vector<8x1xf32>
    %121 = tpu.reciprocal %120 {approx = true} : vector<8x1xf32> -> vector<8x1xf32>
    %c0_42 = arith.constant 0 : index
    %c0_43 = arith.constant 0 : index
    %122 = vector.load %arg8[%c0_42, %c0_43] : memref<8x14xf32, #tpu.memory_space<vmem>>, vector<8x14xf32>
    %123 = vector.broadcast %110 : vector<8x1xf32> to vector<8x14xf32>
    %124 = arith.subf %106, %123 : vector<8x14xf32>
    %125 = arith.mulf %122, %124 : vector<8x14xf32>
    %126 = vector.broadcast %121 : vector<8x1xf32> to vector<8x14xf32>
    %127 = arith.mulf %125, %126 : vector<8x14xf32>
    %c0_44 = arith.constant 0 : index
    %c0_45 = arith.constant 0 : index
    %128 = vector.load %arg9[%c0_44, %c0_45] : memref<8x14xf32, #tpu.memory_space<vmem>>, vector<8x14xf32>
    %129 = arith.addf %127, %128 : vector<8x14xf32>
    %cst_46 = arith.constant 0.000000e+00 : f32
    %130 = vector.broadcast %cst_46 : f32 to vector<8x14xf32>
    %131 = arith.cmpf ogt, %129, %130 : vector<8x14xf32>
    %cst_47 = arith.constant 2.000000e-01 : f32
    %132 = vector.broadcast %cst_47 : f32 to vector<8x14xf32>
    %133 = arith.mulf %132, %129 : vector<8x14xf32>
    %134 = arith.select %131, %129, %133 : vector<8x14xi1>, vector<8x14xf32>
    %c0_48 = arith.constant 0 : index
    %c0_49 = arith.constant 0 : index
    %c0_50 = arith.constant 0 : index
    %135 = vector.load %arg10[%c0_48, %c0_49, %c0_50] : memref<1x8x14xf32, #tpu.memory_space<vmem>>, vector<1x8x14xf32>
    %136 = vector.shape_cast %135 : vector<1x8x14xf32> to vector<8x14xf32>
    %137 = vector.shape_cast %134 : vector<8x14xf32> to vector<1x8x14xf32>
    tpu.vector_store %arg10[%c0_48, %c0_49, %c0_50], %137 {strides = array<i32>} : memref<1x8x14xf32, #tpu.memory_space<vmem>>, vector<1x8x14xf32>,
    return
  }
  func.func @transform_0(%arg0: i32) -> (i32, i32, i32) {
    %c0_i32 = arith.constant 0 : i32
    %c0_i32_0 = arith.constant 0 : i32
    %c0_i32_1 = arith.constant 0 : i32
    return %arg0, %c0_i32, %c0_i32_0 : i32, i32, i32
  }
  func.func @transform_1(%arg0: i32) -> (i32, i32) {
    %c0_i32 = arith.constant 0 : i32
    %c0_i32_0 = arith.constant 0 : i32
    %c0_i32_1 = arith.constant 0 : i32
    return %c0_i32, %c0_i32_0 : i32, i32
  }
  func.func @transform_2(%arg0: i32) -> (i32, i32) {
    %c0_i32 = arith.constant 0 : i32
    %c0_i32_0 = arith.constant 0 : i32
    %c0_i32_1 = arith.constant 0 : i32
    return %c0_i32, %c0_i32_0 : i32, i32
  }
  func.func @transform_3(%arg0: i32) -> (i32, i32) {
    %c0_i32 = arith.constant 0 : i32
    %c0_i32_0 = arith.constant 0 : i32
    %c0_i32_1 = arith.constant 0 : i32
    return %c0_i32, %c0_i32_0 : i32, i32
  }
  func.func @transform_4(%arg0: i32) -> (i32, i32) {
    %c0_i32 = arith.constant 0 : i32
    %c0_i32_0 = arith.constant 0 : i32
    %c0_i32_1 = arith.constant 0 : i32
    return %c0_i32, %c0_i32_0 : i32, i32
  }
  func.func @transform_5(%arg0: i32) -> (i32, i32) {
    %c0_i32 = arith.constant 0 : i32
    %c0_i32_0 = arith.constant 0 : i32
    %c0_i32_1 = arith.constant 0 : i32
    return %c0_i32, %c0_i32_0 : i32, i32
  }
  func.func @transform_6(%arg0: i32) -> (i32, i32) {
    %c0_i32 = arith.constant 0 : i32
    %c0_i32_0 = arith.constant 0 : i32
    %c0_i32_1 = arith.constant 0 : i32
    return %c0_i32, %c0_i32_0 : i32, i32
  }
  func.func @transform_7(%arg0: i32) -> (i32, i32) {
    %c0_i32 = arith.constant 0 : i32
    %c0_i32_0 = arith.constant 0 : i32
    %c0_i32_1 = arith.constant 0 : i32
    return %c0_i32, %c0_i32_0 : i32, i32
  }
  func.func @transform_8(%arg0: i32) -> (i32, i32) {
    %c0_i32 = arith.constant 0 : i32
    %c0_i32_0 = arith.constant 0 : i32
    %c0_i32_1 = arith.constant 0 : i32
    return %c0_i32, %c0_i32_0 : i32, i32
  }
  func.func @transform_9(%arg0: i32) -> (i32, i32, i32) {
    %c0_i32 = arith.constant 0 : i32
    %c0_i32_0 = arith.constant 0 : i32
    %c0_i32_1 = arith.constant 0 : i32
    return %arg0, %c0_i32, %c0_i32_0 : i32, i32, i32
  }
}

</mosaic_0001>

<bundles_post_ra>
// kernel: tpu_custom_call.1
= control target key start
LH: loop header
LB: loop body
LE: loop exit
PB: predicated region body
PF: predicated region fallthrough
CT: control target
= control target key end

     0   :  { %14 = vsyncpa [#allocation3], 0  ;;  %s1741_s0 = inlined_call_operand.vmem [shape: f32[2,6,64], index: 0, kind: input, shape index: {}]   ;;  %s1742_s1 = inlined_call_operand.vmem [shape: f32[1,64], index: 1, kind: input, shape index: {}]   ;;  %s1743_s2 = inlined_call_operand.vmem [shape: f32[1,64], index: 2, kind: input, shape index: {}]   ;;  %s1744_s3 = inlined_call_operand.vmem [shape: f32[8,31], index: 3, kind: input, shape index: {}]   ;;  %s1745_s4 = inlined_call_operand.vmem [shape: f32[8,30], index: 4, kind: input, shape index: {}]   ;;  %s1746_s5 = inlined_call_operand.vmem [shape: f32[8,30], index: 5, kind: input, shape index: {}]   ;;  %s1747_s6 = inlined_call_operand.vmem [shape: f32[8,25], index: 6, kind: input, shape index: {}]   ;;  %s1748_s7 = inlined_call_operand.vmem [shape: f32[8,14], index: 7, kind: input, shape index: {}]   ;;  %s1749_s8 = inlined_call_operand.vmem [shape: f32[8,14], index: 8, kind: input, shape index: {}]   ;;  %s1750_s9 = inlined_call_operand.hbm [shape: f32[2,8,14], index: 9, kind: output, shape index: {}]  }
   0x1   :  { %16 = vsyncpa [#allocation3 + $0x1], 0  ;;  %s1472_s30 = smov 0   ;;  %s1474_s10 = smov 0  }
   0x2   :  { %s1476_s11 = smov 0   ;;  %s1478_s12 = smov 0  }
   0x3 LB: > { %s1493_s13 = sadd.s32 4294967295, %s1409_s12   ;;  %s1052_s14 = sadd.s32 4294967294, %s1409_s12   ;;  %s1409_s12 = sphi %s1478_s12, %s1762_s12   ;;  %s1405_s11 = sphi %s1476_s11, %s1761_s11   ;;  %s1401_s10 = sphi %s1474_s10, %s1760_s10   ;;  %s1397_s30 = sphi %s1472_s30, %s1759_s30  }
   0x4   : > { %s1497_s15 = sadd.s32 1, %s1409_s12   ;;  %s223_s16 = sadd.s32 1, %s1405_s11 }
   0x5   : > { %s220_s17 = ssub.s32 %s1409_s12, %s1497_s15  ;;  %p233_p0 = scmp.ne.s32.totalorder %s1405_s11, %s1401_s10 }
   0x6   : > { %p221_p1 = scmp.eq.s32.totalorder %s220_s17, 0  ;;  %p234_p2 = scmp.eq.s32.totalorder %s1493_s13, 1 }
   0x7   : > { %p239_p3 = scmp.ne.s32.totalorder %s1401_s10, %s1397_s30  ;;  %p240_p4 = scmp.eq.s32.totalorder %s1052_s14, 1 }
   0x8   : > { %s1508_s18 = scalar_select %p221_p1, %s1405_s11, %s223_s16  }
   0x9   : > { %p1510_p5 = por %p234_p2, %p233_p0  ;;  %p1514_p6 = por %p240_p4, %p239_p3 }
   0xa   : > { %p1055_p7 = scmp.ge.s32.totalorder %s1409_s12, 1  ;;  %p289_p8 = scmp.lt.s32.totalorder %s1409_s12, 3 }
   0xc   : > { %p290_p9 = pnand %p1055_p7, %p289_p8 }
   0xd   : > { %p324_p10 = scmp.lt.s32.totalorder (!%p290_p9), %s1493_s13, 1  ;;  %vm329_vm0 = vcmask (!%p290_p9), 521216   ;;  %v1058_v15 = vld [vmem:[%s1742_s1] ss:$0 sm:$0xff] (!%p290_p9)  ;;  %v1411_v17 = vmov (!%p290_p9), 0.0|0.0   ;;  %s1412_s14 = smov (!%p290_p9), 125   ;;  %v471_v25 = vlaneseq (!%p290_p9) }
   0xe   : > { %293 = sbr.rel (%p290_p9) target bundleno = 2132 (0x854), region = 56  ;;  %1232 = vmatprep.subr.bf16.mxu0 (!%p290_p9), %v1411_v17  ;;  %1239 = vmatprep.subr.bf16.mxu1 (!%p290_p9), %v1411_v17  ;;  %v1059_v19 = vld [vmem:[%s1743_s2] ss:$0 sm:$0xff] (!%p290_p9)  ;;  %s1413_s16 = smov (!%p290_p9), 127   ;;  %vm1414_vm3 = vmmov (!%p290_p9), 0   ;;  %v1415_v24 = vmov (!%p290_p9), 0.0  }
   0xf   : > { %1158 = vmatprep.mubr.msk.f32.mxu0 (!%p290_p9), %vm1414_vm3, %v1415_v24  ;;  %1177 = vmatprep.mubr.msk.f32.mxu1 (!%p290_p9), %vm1414_vm3, %v1415_v24  ;;  %v1538_v27 = vshrl.u32 (!%p290_p9), %v471_v25, 7  ;;  %v481_v28 = vand.u32 (!%p290_p9), 127, %v471_v25  ;;  %s1416_s17 = smov (!%p290_p9), 126   ;;  %v1418_v36 = vmov (!%p290_p9), 1.0|1.0   ;;  %v391_v49 = vld [vmem:[%s1744_s3] sm:$0xff] (!%p290_p9) }
  0x10   : > { %v1420_v55 = vmov (!%p290_p9), 1.0   ;;  %v718_v33 = vld [vmem:[%s1747_s6] sm:$0xff] (!%p290_p9)  ;;  %s1109_s24 = sshll.u32 (!%p290_p9), %s1493_s13, 7 }
  0x11   : > { %v473_v29 = vadd.s32 (!%p290_p9), 8, %v1538_v27  ;;  %v1542_v30 = vmul.u32 (!%p290_p9), 2, %v481_v28  ;;  %v1545_v31 = vadd.s32 (!%p290_p9), 16, %v1538_v27  ;;  %v1548_v32 = vadd.s32 (!%p290_p9), 24, %v1538_v27  ;;  %s1698_s29 = scalar_lea.hbm (!%p290_p9), %s1750_s9, %s1109_s24 }
  0x12   : > { %v476_v34 = vadd.s32 (!%p290_p9), 32, %v1538_v27  ;;  %v477_v35 = vadd.s32 (!%p290_p9), 40, %v1538_v27  ;;  %v479_v51 = vadd.s32 (!%p290_p9), 56, %v1538_v27  ;;  %v478_v52 = vadd.s32 (!%p290_p9), 48, %v1538_v27 }
  0x13   : > { %vm483_vm4 = vcmp.eq.s32.totalorder (!%p290_p9), %v1538_v27, %v1542_v30  ;;  %vm484_vm5 = vcmp.eq.s32.totalorder (!%p290_p9), %v473_v29, %v1542_v30  ;;  %vm485_vm6 = vcmp.eq.s32.totalorder (!%p290_p9), %v1545_v31, %v1542_v30  ;;  %vm486_vm8 = vcmp.eq.s32.totalorder (!%p290_p9), %v1548_v32, %v1542_v30 }
  0x14   : > { %vm1555_vm7 = vmpackc.low (!%p290_p9), %vm484_vm5, %vm483_vm4  ;;  %v1567_v37 = vadd.s32 (!%p290_p9), 1, %v1542_v30  ;;  %vm487_vm10 = vcmp.eq.s32.totalorder (!%p290_p9), %v476_v34, %v1542_v30  ;;  %vm488_vm11 = vcmp.eq.s32.totalorder (!%p290_p9), %v477_v35, %v1542_v30  ;;  %vm396_vm4 = vcmask (!%p290_p9), 1046528  }
  0x15   : > { %s325_s21 = scalar_select %p324_p10, %s1493_s13, 1  ;;  %1241 = vmatpush3.bf16.msk.msra.mxu1 %vm1555_vm7, %v1418_v36  ;;  %vm1243_vm9 = vmpackc.low %vm486_vm8, %vm485_vm6  ;;  %vm1419_vm5 = vmmov 1   ;;  %v1065_v59 = vsel %vm486_vm8, 1.0, %v1415_v24  ;;  %vm683_vm8 = vcmask 244736  }
  0x16   : > { %1242 = vmatprep.subr.bf16.mxu1 %v1411_v17  ;;  %vm589_vm12 = vcmp.eq.s32.totalorder %v476_v34, %v1567_v37  ;;  %vm590_vm13 = vcmp.eq.s32.totalorder %v477_v35, %v1567_v37  ;;  %vm1246_vm14 = vmpackc.low %vm488_vm11, %vm487_vm10  ;;  %vm585_vm10 = vcmp.eq.s32.totalorder %v1538_v27, %v1567_v37  ;;  %vm586_vm11 = vcmp.eq.s32.totalorder %v473_v29, %v1567_v37  ;;  %s1421_s13 = smov [#allocation2]  }
  0x17   : > { %s1057_s22 = sshll.u32 %s325_s21, 3  ;;  %s1417_s21 = smov 124   ;;  %vm1582_vm15 = vmpackc.low %vm590_vm13, %vm589_vm12  ;;  %vm392_vm12 = vcmask 252928   ;;  %v1276_v62 = vpack.c.bf16 %v1065_v59, %v1420_v55 }
  0x18   : > { %s327_s25 = scalar_lea.vmem %s1741_s0, %s1057_s22  ;;  %vm1598_vm13 = vmpackc.low %vm586_vm11, %vm585_vm10  ;;  %vm489_vm10 = vcmp.eq.s32.totalorder %v478_v52, %v1542_v30 }
  0x19   : > { %v328_v0 = vld [vmem:[%s327_s25] sm:$0x3f]  ;;  %1244 = vmatpush3.bf16.msk.msra.mxu1 %vm1243_vm9, %v1418_v36  ;;  %vm1237_vm9 = vmpackc.low %vm396_vm4, %vm1419_vm5  ;;  %vm490_vm4 = vcmp.eq.s32.totalorder %v479_v51, %v1542_v30 }
  0x1a   : > { %v330_v1 = vsel %vm329_vm0, %v328_v0, 0.0  ;;  %1245 = vmatprep.subr.bf16.mxu1 %v1411_v17  ;;  %v1069_v53 = vsel %vm490_vm4, 1.0, %v1415_v24 }
  0x1b   : > { %331 = vadd.xlane.f32.xlu0 %v330_v1  ;;  %v1249_v56 = vpack.c.bf16 %v1069_v53, %v1420_v55  ;;  %v970_v53 = vld [vmem:[%s1748_s7] sm:$0xff] }
  0x1d   : > { %1247 = vmatpush3.bf16.msk.msra.mxu1 %vm1246_vm14, %v1418_v36  ;;  %vm587_vm14 = vcmp.eq.s32.totalorder %v1545_v31, %v1567_v37 }
  0x1e   : > { %1248 = vmatprep.subr.bf16.mxu1 %v1411_v17 }
  0xa8   : > { %v332_v2 = vpop.xlane.xlu0 %331 }
  0xa9   : > { %v334_v3 = vmul.f32 0.015625, %v332_v2 }
  0xab   : > { %v335_v4 = vsub.f32 %v328_v0, %v334_v3 }
  0xad   : > { %v336_v5 = vmul.f32 %v335_v4, %v335_v4  ;;  %v358_v16 = vmul.f32 %v1058_v15, %v335_v4 }
  0xaf   : > { %v337_v6 = vsel %vm329_vm0, %v336_v5, 0.0  ;;  %vm384_vm0 = vcmask 1045504  }
  0xb0   : > { %338 = vadd.xlane.f32.xlu0 %v337_v6 }
 0x13d   : > { %v339_v7 = vpop.xlane.xlu0 %338 }
 0x13e   : > { %v341_v8 = vmul.f32 0.015873017, %v339_v7 }
 0x140   : > { %1335 = vrsqrt.f32 %v341_v8  ;;  %vm344_vm1 = vcmp.eq.f32.partialorder %v341_v8, inf  ;;  %v347_v11 = vand.u32 2147483648, %v341_v8  ;;  %vm346_vm2 = vcmp.eq.f32.partialorder %v341_v8, 0.0 }
 0x14a   : > { %v1336_v9 = vpop.eup %1335 }
 0x14b   : > { %v343_v10 = vmul.f32 %v1336_v9, %v341_v8 }
 0x14d   : > { %v345_v12 = vsel %vm344_vm1, %v341_v8, %v343_v10  ;;  %vm386_vm1 = vcmask 1043456  }
 0x14e   : > { %v348_v13 = vsel %vm346_vm2, %v347_v11, %v345_v12  ;;  %vm388_vm2 = vcmask 1041408   ;;  %vm1250_vm11 = vmpackc.low %vm386_vm1, %vm489_vm10 }
 0x14f   : > { %v349_v14 = vadd.f32 1e-06, %v348_v13  ;;  %1251 = vmatpush3.bf16.msk.msra.mxu1 %vm1250_vm11, %v1249_v56  ;;  %vm1277_vm4 = vmpackc.low %vm386_vm1, %vm485_vm6  ;;  %vm948_vm11 = vcmask 113664   ;;  %v973_v56 = vld [vmem:[%s1749_s8] sm:$0xff] }
 0x150   : > { %1265 = vmatprep.subr.bf16.mxu1 %v1411_v17 }
 0x151   : > { %1337 = vrcp.f32 %v349_v14 }
 0x15b   : > { %v1338_v18 = vpop.eup %1337 }
 0x15c   : > { %v359_v20 = vmul.f32 %v1338_v18, %v358_v16 }
 0x15e   : > { %v367_v21 = vadd.f32 %v1059_v19, %v359_v20  ;;  %v705_v19 = vld [vmem:[%s1745_s4] sm:$0xff] }
 0x160   : > { %v377_v22 = vrot.slane %v367_v21, 6  ;;  %v369_v23 = vrot.slane %v367_v21, 2  ;;  %v373_v26 = vrot.slane %v367_v21, 4 }
 0x162   : > { %378 = vrot.lane.b32.xlu0 %v377_v22, %s1412_s14  ;;  %370 = vrot.lane.b32.xlu1 %v369_v23, %s1413_s16  ;;  %v708_v22 = vld [vmem:[%s1746_s5] sm:$0xff]  ;;  %s321_s14 = sand.u32 1, %s1401_s10  }
 0x166   : > { %374 = vrot.lane.b32.xlu1 %v373_v26, %s1416_s17 }
 0x16a   : > { %381 = vrot.lane.b32.xlu1 %v367_v21, %s1417_s21  ;;  %s1056_s21 = sshll.u32 %s321_s14, 3 }
 0x16b   : > { %s323_s25 = scalar_lea.vmem [#allocation2], %s1056_s21  ;;  %s1351_s21 = sshll.u32 %s1421_s13, 4  ;;  %s1352_s21 = int_to_ptr.vmem [resolvable:$false] %s1351_s21 }
 0x16c   : > { %s993_s26 = sshll.u32 %s323_s25, 4  ;;  %s1353_s22 = scalar_lea.vmem %s1352_s21, 256  ;;  %s1700_s26 = int_to_ptr.vmem [resolvable:$true] %s993_s26 }
 0x16d   : > { %p1354_p0 = scmp.lt.s32.totalorder %s1700_s26, %s1352_s21 }
 0x1d4   : > { %v371_v39 = vpop.permute.xlu1 %370  ;;  %v379_v44 = vpop.permute.xlu0 %378 }
 0x1d5   : > { %v385_v41 = vsel %vm384_vm0, %v367_v21, %v371_v39 }
 0x1d8   : > { %v375_v40 = vpop.permute.xlu1 %374 }
 0x1d9   : > { %v387_v42 = vsel %vm386_vm1, %v371_v39, %v375_v40  ;;  %v389_v46 = vsel %vm388_vm2, %v375_v40, %v379_v44 }
 0x1da   : > { %v1233_v43 = vpack.c.bf16 %v387_v42, %v385_v41 }
 0x1dc   : > { %1234 = vmatpush3.bf16.msra.mxu0 %v1233_v43  ;;  %v382_v45 = vpop.permute.xlu1 %381 }
 0x1dd   : > { %v390_v47 = vsel %vm384_vm0, %v382_v45, 1.0  ;;  %1235 = vmatprep.subr.bf16.mxu0 %v1411_v17  ;;  %vm588_vm0 = vcmp.eq.s32.totalorder %v1548_v32, %v1567_v37 }
 0x1de   : > { %v1236_v48 = vpack.c.bf16 %v390_v47, %v389_v46  ;;  %vm1256_vm2 = vmpackc.low %vm588_vm0, %vm587_vm14  ;;  %v1082_v34 = vsel %vm588_vm0, 1.0, %v1415_v24  ;;  %vm797_vm0 = vcmask 228352  }
 0x1df   : > { %v1283_v35 = vpack.c.bf16 %v1082_v34, %v1420_v55 }
 0x1e0   : > { %1238 = vmatpush3.bf16.msk.msra.mxu0 %vm1237_vm9, %v1236_v48  ;;  %vm592_vm9 = vcmp.eq.s32.totalorder %v479_v51, %v1567_v37 }
 0x1e1   : > { %1252 = vmatprep.subr.bf16.mxu0 %v1411_v17  ;;  %v1086_v54 = vsel %vm592_vm9, 1.0, %v1415_v24  ;;  %vm723_vm9 = vcmask 1040384  }
 0x1e2   : > { %v1262_v57 = vpack.c.bf16 %v1086_v54, %v1420_v55  ;;  %vm1270_vm10 = vmpackc.low %vm723_vm9, %vm1419_vm5 }
 0x1e3   : > { %1159 = vmatmul.mubr.msk.f32.vlgmr.msra.gmra.mrb[0].mxu0 %vm392_vm12, %v391_v49  ;;  %vm1284_vm5 = vmpackc.low %vm386_vm1, %vm587_vm14 }
 0x1e4   : > { %1254 = vmatpush3.bf16.msk.msra.mxu0 %vm1598_vm13, %v1418_v36  ;;  %1196 = vmatprep.mubr.msk.f32.mxu0 %vm1414_vm3, %v1415_v24 }
 0x1e5   : > { %1255 = vmatprep.subr.bf16.mxu0 %v1411_v17 }
 0x1e8   : > { %1257 = vmatpush3.bf16.msk.msra.mxu0 %vm1256_vm2, %v1418_v36  ;;  %vm507_vm2 = vcmask 490496  }
 0x1e9   : > { %1258 = vmatprep.subr.bf16.mxu0 %v1411_v17 }
 0x1ec   : > { %1260 = vmatpush3.bf16.msk.msra.mxu0 %vm1582_vm15, %v1418_v36  ;;  %vm591_vm15 = vcmp.eq.s32.totalorder %v478_v52, %v1567_v37 }
 0x1ed   : > { %1261 = vmatprep.subr.bf16.mxu0 %v1411_v17  ;;  %vm1263_vm12 = vmpackc.low %vm386_vm1, %vm591_vm15  ;;  %vm719_vm15 = vcmask 203776  }
 0x1f0   : > { %1264 = vmatpush3.bf16.msk.msra.mxu0 %vm1263_vm12, %v1262_v57 }
 0x1f1   : > { %1272 = vmatprep.subr.bf16.mxu0 %v1411_v17 }
 0x2b6   : > { %v466_v58 = vpop.f32.mrb[0].mxu0 }
 0x2b7   : > { %v470_v60 = vand.u32 2147483647, %v466_v58  ;;  %v1160_v61 = vpop.f32.mrb[1].mxu0 }
 0x2b9   : > { %1178 = vmatmul.mubr.msk.f32.vlgmr.msra.gmra.mrb[0].mxu1 %vm507_vm2, %v470_v60  ;;  %1197 = vmatmul.mubr.msk.f32.vlgmr.msra.gmra.mrb[2].mxu0 %vm507_vm2, %v470_v60 }
 0x2ba   : > { %1207 = vmatprep.mubr.msk.f32.mxu1 %vm1414_vm3, %v1415_v24  ;;  %1274 = vmatpush3.bf16.msk.msra.mxu0 %vm1555_vm7, %v1418_v36 }
 0x2bb   : > { %1275 = vmatprep.subr.bf16.mxu0 %v1411_v17  ;;  %1218 = vmatprep.mubr.msk.f32.mxu0 %vm1414_vm3, %v1415_v24 }
 0x2be   : > { %1278 = vmatpush3.bf16.msk.msra.mxu0 %vm1277_vm4, %v1276_v62 }
 0x38c   : > { %v580_v63 = vpop.f32.mrb[0].mxu1  ;;  %v678_v0 = vpop.f32.mrb[2].mxu0 }
 0x38d   : > { %v682_v1 = vmax.f32 %v580_v63, %v678_v0  ;;  %v1179_v2 = vpop.f32.mrb[1].mxu1  ;;  %v1198_v3 = vpop.f32.mrb[3].mxu0 }
 0x38f   : > { %v684_v4 = vsel %vm683_vm8, %v682_v1, 0.0 }
 0x390   : > { %685 = vadd.xlane.f32.xlu1 %v684_v4 }
 0x41d   : > { %v686_v5 = vpop.xlane.xlu1 %685 }
 0x41e   : > { %v688_v6 = vmul.f32 0.033333335, %v686_v5 }
 0x420   : > { %v689_v7 = vsub.f32 %v682_v1, %v688_v6 }
 0x422   : > { %v690_v8 = vmul.f32 %v689_v7, %v689_v7  ;;  %v706_v20 = vmul.f32 %v705_v19, %v689_v7 }
 0x424   : > { %v691_v9 = vsel %vm683_vm8, %v690_v8, 0.0 }
 0x425   : > { %692 = vadd.xlane.f32.xlu0 %v691_v9 }
 0x4b2   : > { %v693_v10 = vpop.xlane.xlu0 %692 }
 0x4b3   : > { %v695_v11 = vmul.f32 0.03448276, %v693_v10 }
 0x4b5   : > { %1339 = vrsqrt.f32 %v695_v11  ;;  %vm698_vm6 = vcmp.eq.f32.partialorder %v695_v11, inf  ;;  %v701_v14 = vand.u32 2147483648, %v695_v11  ;;  %vm700_vm7 = vcmp.eq.f32.partialorder %v695_v11, 0.0 }
 0x4bf   : > { %v1340_v12 = vpop.eup %1339 }
 0x4c0   : > { %v697_v13 = vmul.f32 %v1340_v12, %v695_v11 }
 0x4c2   : > { %v699_v15 = vsel %vm698_vm6, %v695_v11, %v697_v13 }
 0x4c3   : > { %v702_v16 = vsel %vm700_vm7, %v701_v14, %v699_v15 }
 0x4c4   : > { %v703_v18 = vadd.f32 1e-06, %v702_v16 }
 0x4c6   : > { %1341 = vrcp.f32 %v703_v18 }
 0x4d0   : > { %v1342_v21 = vpop.eup %1341 }
 0x4d1   : > { %v707_v23 = vmul.f32 %v1342_v21, %v706_v20 }
 0x4d3   : > { %v709_v25 = vadd.f32 %v708_v22, %v707_v23 }
 0x4d5   : > { %v710_v26 = vmax.f32 %v709_v25, 0.0 }
 0x4d7   : > { %715 = vrot.lane.b32.xlu0 %v710_v26, %s1416_s17  ;;  %712 = vrot.lane.b32.xlu1 %v710_v26, %s1413_s16  ;;  %s980_s16 = scalar_lea.sflag [#allocation3], %s321_s14  ;;  %s1347_s17 = scalar_lea.vmem %s1700_s26, 128 }
 0x4d8   : > { %p1348_p11 = scmp.ne.s32.totalorder %s1700_s26, %s1347_s17  ;;  %p1355_p1 = scmp.lt.s32.totalorder %s1353_s22, %s1347_s17 }
 0x4da   : > { %p1349_p12 = pnand %p1348_p11, %p1510_p5  ;;  %p1356_p2 = por %p1355_p1, %p1354_p0 }
 0x4dc   : > { %p1350_p13 = pneg %p1349_p12 }
 0x4de   : > { %p1357_p3 = pnand %p1356_p2, %p1350_p13 }
 0x549   : > { %v713_v27 = vpop.permute.xlu1 %712  ;;  %v716_v29 = vpop.permute.xlu0 %715 }
 0x54a   : > { %v1266_v28 = vpack.c.bf16 %v713_v27, %v710_v26  ;;  %v1269_v30 = vpack.c.bf16 %v1420_v55, %v716_v29 }
 0x54c   : > { %1267 = vmatpush3.bf16.msra.mxu1 %v1266_v28 }
 0x54d   : > { %1268 = vmatprep.subr.bf16.mxu1 %v1411_v17 }
 0x550   : > { %1271 = vmatpush3.bf16.msk.msra.mxu1 %vm1270_vm10, %v1269_v30 }
 0x551   : > { %1279 = vmatprep.subr.bf16.mxu1 %v1411_v17 }
 0x553   : > { %1208 = vmatmul.mubr.msk.f32.vlgmr.msra.gmra.mrb[2].mxu1 %vm719_vm15, %v718_v33 }
 0x554   : > { %1281 = vmatpush3.bf16.msk.msra.mxu1 %vm1598_vm13, %v1418_v36  ;;  %1229 = vmatprep.mubr.msk.f32.mxu1 %vm1414_vm3, %v1415_v24 }
 0x555   : > { %1282 = vmatprep.subr.bf16.mxu1 %v1411_v17 }
 0x558   : > { %1285 = vmatpush3.bf16.msk.msra.mxu1 %vm1284_vm5, %v1283_v35 }
 0x626   : > { %v793_v32 = vpop.f32.mrb[2].mxu1 }
 0x627   : > { %v1209_v38 = vpop.f32.mrb[3].mxu1  ;;  %1219 = vmatmul.mubr.msk.f32.vlgmr.msra.gmra.mrb[4].mxu0 %vm797_vm0, %v793_v32  ;;  %1230 = vmatmul.mubr.msk.f32.vlgmr.msra.gmra.mrb[4].mxu1 %vm797_vm0, %v793_v32 }
 0x6fa   : > { %v870_v39 = vpop.f32.mrb[4].mxu0  ;;  %v943_v40 = vpop.f32.mrb[4].mxu1 }
 0x6fb   : > { %v947_v36 = vmax.f32 %v870_v39, %v943_v40  ;;  %v1220_v41 = vpop.f32.mrb[5].mxu0  ;;  %v1231_v42 = vpop.f32.mrb[5].mxu1 }
 0x6fd   : > { %v949_v24 = vsel %vm948_vm11, %v947_v36, 0.0 }
 0x6fe   : > { %950 = vadd.xlane.f32.xlu1 %v949_v24 }
 0x78b   : > { %v951_v17 = vpop.xlane.xlu1 %950 }
 0x78c   : > { %v953_v43 = vmul.f32 0.071428575, %v951_v17 }
 0x78e   : > { %v954_v31 = vsub.f32 %v947_v36, %v953_v43 }
 0x790   : > { %v955_v37 = vmul.f32 %v954_v31, %v954_v31  ;;  %v971_v54 = vmul.f32 %v970_v53, %v954_v31 }
 0x792   : > { %v956_v44 = vsel %vm948_vm11, %v955_v37, 0.0 }
 0x793   : > { %957 = vadd.xlane.f32.xlu0 %v956_v44 }
 0x820   : > { %v958_v45 = vpop.xlane.xlu0 %957 }
 0x821   : > { %v960_v46 = vmul.f32 0.07692308, %v958_v45 }
 0x823   : > { %1343 = vrsqrt.f32 %v960_v46  ;;  %vm963_vm3 = vcmp.eq.f32.partialorder %v960_v46, inf  ;;  %v966_v49 = vand.u32 2147483648, %v960_v46  ;;  %vm965_vm1 = vcmp.eq.f32.partialorder %v960_v46, 0.0 }
 0x82d   : > { %v1344_v47 = vpop.eup %1343 }
 0x82e   : > { %v962_v48 = vmul.f32 %v1344_v47, %v960_v46 }
 0x830   : > { %v964_v50 = vsel %vm963_vm3, %v960_v46, %v962_v48 }
 0x831   : > { %v967_v51 = vsel %vm965_vm1, %v966_v49, %v964_v50 }
 0x832   : > { %v968_v52 = vadd.f32 1e-06, %v967_v51 }
 0x834   : > { %1345 = vrcp.f32 %v968_v52 }
 0x83e   : > { %v1346_v55 = vpop.eup %1345 }
 0x83f   : > { %v972_v57 = vmul.f32 %v1346_v55, %v971_v54 }
 0x841   : > { %v974_v58 = vadd.f32 %v973_v56, %v972_v57 }
 0x843   : > { %vm975_vm13 = vcmp.gt.f32.partialorder %v974_v58, 0.0  ;;  %v976_v59 = vmul.f32 0.2, %v974_v58 }
 0x845   : > { %v977_v60 = vsel %vm975_vm13, %v974_v58, %v976_v59 }
 0x846   : > { %978 = vst.msk [vmem:[%s323_s25] sm:$0xff] %vm948_vm11, %v977_v60 }
 0x847   : > { %1360 = shalt.err (!%p1357_p3)
}
 0x848   : > { %s1361_s14 = scalar_lea.hbm %s1698_s29, 128  ;;  %s1365_s25 = scalar_lea.hbm %s1750_s9, 256 }
 0x849   : > { %p1362_p4 = scmp.ne.s32.totalorder %s1698_s29, %s1361_s14  ;;  %p1366_p9 = scmp.lt.u32.totalorder %s1698_s29, %s1750_s9 }
 0x84a   : > { %p1367_p10 = scmp.lt.u32.totalorder %s1365_s25, %s1361_s14  ;;  %p1369_p12 = scmp.lt.u32.totalorder %s1361_s14, %s1698_s29 }
 0x84b   : > { %p1363_p7 = pnand %p1362_p4, %p1510_p5 }
 0x84c   : > { %p1368_p11 = por %p1367_p10, %p1366_p9 }
 0x84d   : > { %p1364_p8 = pneg %p1363_p7 }
 0x84e   : > { %p1370_p13 = por %p1369_p12, %p1368_p11 }
 0x850   : > { %p1371_p0 = pnand %p1370_p13, %p1364_p8 }
 0x852   : > { %1374 = shalt.err (!%p1371_p0)
}
 0x853   : > { %1286 = dma.vmem_to_hbm [thread:$0]  (%p1510_p5), %s1700_s26, 128, %s1698_s29, %s980_s16  }
 0x854 PF: > { %p1292_p1 = scmp.ge.s32.totalorder %s1409_s12, 2  ;;  %s1005_s17 = sand.u32 1, %s1397_s30  }
 0x855   : > { %s1006_s13 = scalar_lea.sflag [#allocation3], %s1005_s17 }
 0x856   : > { %p1289_p2 = pnand %p1292_p1, %p1514_p6 }
 0x858   : > { %1392 = dma.done.wait (!%p1289_p2), %s1006_s13, 128  }
 0x859   : > { %1394 = vsyncadd (!%p1289_p2), %s1006_s13, 4294967168  ;;  %p19_p3 = scmp.ge.s32.totalorder %s1497_s15, 4   ;;  %s1759_s30 = smov %s1401_s10 }
 0x85a   : > { %s1760_s10 = smov %s1405_s11  ;;  %s1761_s11 = smov %s1508_s18 }
 0x85b   : > { %s1762_s12 = smov %s1497_s15  ;;  %21 = sbr.rel (!%p19_p3) target bundleno = 3 (0x3), region = 91 }
 0x862   :  { %1011 = vsyncpa [#allocation3], 1 }
 0x863   :  { %1013 = vsyncpa [#allocation3 + $0x1], 1 }

</bundles_post_ra>
